<compile_context>
chip_gen: v6e
topology: v6e:2x2x1
jax: 0.10.0
libtpu: 0.0.40
codegen_flags: <defaults>
</compile_context>

<pallas_src>
import functools
import math

import jax
import jax.numpy as jnp
from jax.experimental import pallas as pl
from jax.experimental.pallas import tpu as pltpu

LN_EPS = 1e-12                      # BERT LayerNorm epsilon
_VMEM_LIMIT = 48 * 1024 * 1024      # raise default scoped VMEM, below all physical


def _round_up(x, m):
    return ((x + m - 1) // m) * m


def _pick_tile(dim, pref, unit):
    """Largest tile <= pref that divides dim and is a multiple of `unit`
    (falls back to the full dim for small / awkward sizes)."""
    if dim <= pref:
        return dim
    t = (pref // unit) * unit
    while t >= unit:
        if dim % t == 0:
            return t
        t -= unit
    return dim


# ----------------------------------------------------------------------------
# In-kernel helpers (traced inside Pallas kernels)
# ----------------------------------------------------------------------------
def _add_layernorm(x, res, gamma, beta, inv_h):
    """Residual add + LayerNorm (two-pass, centered), f32 math."""
    h = x + res
    mu = jnp.sum(h, axis=-1, keepdims=True) * inv_h
    d = h - mu
    var = jnp.sum(d * d, axis=-1, keepdims=True) * inv_h
    return d * jax.lax.rsqrt(var + LN_EPS) * gamma + beta


def _mha_ctx(q, k, v, mask, ctx_ref, *, n_heads):
    """Per-head attention; normalized per-head contexts are written into the
    (Sq, H) f32 VMEM scratch `ctx_ref` so the caller can do ONE K=H output
    projection instead of n_heads K=Dh matmuls.

    q: (Sq, H) f32   k, v: (Skv, H) f32   mask: (1, Skv) additive f32 or None.
    The 1/sqrt(Dh) scale is folded into the Q projection weights at init time.
    """
    hidden = q.shape[-1]
    dh = hidden // n_heads
    qb = q.astype(jnp.bfloat16)
    kb = k.astype(jnp.bfloat16)
    vb = v.astype(jnp.bfloat16)
    if mask is not None:
        # hoist the (1,Skv)->(Sq,Skv) broadcast out of the head loop
        mask = jnp.broadcast_to(mask, (q.shape[0], mask.shape[-1]))
    for hh in range(n_heads):                      # static unrolled head loop
        sl = slice(hh * dh, (hh + 1) * dh)
        # scores (Sq, Skv), f32 accumulation on the MXU
        s = jnp.einsum("qd,kd->qk", qb[:, sl], kb[:, sl],
                       preferred_element_type=jnp.float32)
        if mask is not None:
            s = s + mask
        m = jnp.max(s, axis=-1, keepdims=True)
        p = jnp.exp(s - m)
        l = jnp.sum(p, axis=-1, keepdims=True)
        ctx = jnp.einsum("qk,kd->qd", p.astype(jnp.bfloat16), vb[:, sl],
                         preferred_element_type=jnp.float32)
        # normalize the small (Sq, Dh) tensor with an EUP reciprocal
        ctx_ref[:, sl] = ctx * pl.reciprocal(l, approx=True)


# ----------------------------------------------------------------------------
# Pallas kernels
# ----------------------------------------------------------------------------
def _self_attn_kernel(hq_ref, hf_ref, wq_ref, bq_ref, wkv_ref, bkv_ref,
                      wo_ref, bo_ref, g_ref, b_ref, o_ref, ctx_ref,
                      *, n_heads, hidden, inv_h):
    hq = hq_ref[0]                                          # (tS, H) f32 query rows
    hf = hf_ref[0]                                          # (S,  H) f32 full sequence
    q = jnp.dot(hq.astype(jnp.bfloat16), wq_ref[...],
                preferred_element_type=jnp.float32) + bq_ref[...]
    kv = jnp.dot(hf.astype(jnp.bfloat16), wkv_ref[...],
                 preferred_element_type=jnp.float32) + bkv_ref[...]
    k = kv[:, :hidden]
    v = kv[:, hidden:]
    _mha_ctx(q, k, v, None, ctx_ref, n_heads=n_heads)
    attn = jnp.dot(ctx_ref[...].astype(jnp.bfloat16), wo_ref[...],
                   preferred_element_type=jnp.float32) + bo_ref[...]
    o_ref[0] = _add_layernorm(attn, hq, g_ref[...], b_ref[...], inv_h).astype(o_ref.dtype)


def _cross_attn_kernel(hq_ref, c_ref, m_ref, wq_ref, bq_ref, wkv_ref, bkv_ref,
                       wo_ref, bo_ref, g_ref, b_ref, o_ref, ctx_ref,
                       *, n_heads, hidden, inv_h):
    hq = hq_ref[0]                                          # (tS, H)
    c = c_ref[0]                                            # (Skv, H)
    mask = m_ref[0]                                         # (1, Skv) additive f32
    q = jnp.dot(hq.astype(jnp.bfloat16), wq_ref[...],
                preferred_element_type=jnp.float32) + bq_ref[...]
    kv = jnp.dot(c.astype(jnp.bfloat16), wkv_ref[...],
                 preferred_element_type=jnp.float32) + bkv_ref[...]
    k = kv[:, :hidden]
    v = kv[:, hidden:]
    _mha_ctx(q, k, v, mask, ctx_ref, n_heads=n_heads)
    attn = jnp.dot(ctx_ref[...].astype(jnp.bfloat16), wo_ref[...],
                   preferred_element_type=jnp.float32) + bo_ref[...]
    o_ref[0] = _add_layernorm(attn, hq, g_ref[...], b_ref[...], inv_h).astype(o_ref.dtype)


def _ffn_kernel(h_ref, w1_ref, b1_ref, w2_ref, b2_ref, g_ref, b_ref, o_ref,
                *, inv_h):
    h = h_ref[0]                                            # (tS, H)
    inter = jnp.dot(h.astype(jnp.bfloat16), w1_ref[...],
                    preferred_element_type=jnp.float32) + b1_ref[...]
    # TODO(synk): BERT reference GELU is the erf variant; tanh approx kept
    # (deviation <1e-3, tanh lowers to the EUP on all generations).
    inter = jax.nn.gelu(inter, approximate=True)
    ff = jnp.dot(inter.astype(jnp.bfloat16), w2_ref[...],
                 preferred_element_type=jnp.float32) + b2_ref[...]
    o_ref[0] = _add_layernorm(ff, h, g_ref[...], b_ref[...], inv_h).astype(o_ref.dtype)


def _fc_kernel(x_ref, w_ref, b_ref, o_ref):
    # accumulate straight into the resident f32 output block (no scratch)
    @pl.when(pl.program_id(2) == 0)
    def _():
        o_ref[...] = jnp.broadcast_to(b_ref[...], o_ref.shape)

    o_ref[...] += jnp.dot(x_ref[...], w_ref[...],
                          preferred_element_type=jnp.float32)


# ----------------------------------------------------------------------------
# pallas_call wrappers
# ----------------------------------------------------------------------------
def _rep(shape):
    """Replicated (grid-invariant) full-array block."""
    nd = len(shape)
    return pl.BlockSpec(shape, lambda *args, _nd=nd: (0,) * _nd)


def _cparams(*semantics):
    return pltpu.CompilerParams(dimension_semantics=semantics,
                                vmem_limit_bytes=_VMEM_LIMIT)


def self_attention_block(h, blk, n_heads, t_s):
    B, S, H = h.shape
    return pl.pallas_call(
        functools.partial(_self_attn_kernel, n_heads=n_heads, hidden=H, inv_h=1.0 / H),
        out_shape=jax.ShapeDtypeStruct((B, S, H), h.dtype),
        grid=(B, S // t_s),
        in_specs=[
            pl.BlockSpec((1, t_s, H), lambda b, s: (b, s, 0)),   # query rows / residual
            pl.BlockSpec((1, S, H), lambda b, s: (b, 0, 0)),     # full sequence for K/V
            _rep((H, H)), _rep((1, H)),
            _rep((H, 2 * H)), _rep((1, 2 * H)),
            _rep((H, H)), _rep((1, H)),
            _rep((1, H)), _rep((1, H)),
        ],
        out_specs=pl.BlockSpec((1, t_s, H), lambda b, s: (b, s, 0)),
        scratch_shapes=[pltpu.VMEM((t_s, H), jnp.float32)],
        compiler_params=_cparams("parallel", "parallel"),
    )(h, h, blk["sa_wq"], blk["sa_bq"], blk["sa_wkv"], blk["sa_bkv"],
      blk["sa_wo"], blk["sa_bo"], blk["ln_sa_g"], blk["ln_sa_b"])


def cross_attention_block(h, cond, add_mask, blk, n_heads, t_s):
    B, S, H = h.shape
    Skv = cond.shape[1]
    return pl.pallas_call(
        functools.partial(_cross_attn_kernel, n_heads=n_heads, hidden=H, inv_h=1.0 / H),
        out_shape=jax.ShapeDtypeStruct((B, S, H), h.dtype),
        grid=(B, S // t_s),
        in_specs=[
            pl.BlockSpec((1, t_s, H), lambda b, s: (b, s, 0)),
            pl.BlockSpec((1, Skv, H), lambda b, s: (b, 0, 0)),
            pl.BlockSpec((1, 1, Skv), lambda b, s: (b, 0, 0)),
            _rep((H, H)), _rep((1, H)),
            _rep((H, 2 * H)), _rep((1, 2 * H)),
            _rep((H, H)), _rep((1, H)),
            _rep((1, H)), _rep((1, H)),
        ],
        out_specs=pl.BlockSpec((1, t_s, H), lambda b, s: (b, s, 0)),
        scratch_shapes=[pltpu.VMEM((t_s, H), jnp.float32)],
        compiler_params=_cparams("parallel", "parallel"),
    )(h, cond, add_mask,
      blk["ca_wq"], blk["ca_bq"], blk["ca_wkv"], blk["ca_bkv"],
      blk["ca_wo"], blk["ca_bo"], blk["ln_ca_g"], blk["ln_ca_b"])


def ffn_block(h, blk, t_s):
    B, S, H = h.shape
    inter = blk["ff_w1"].shape[1]
    return pl.pallas_call(
        functools.partial(_ffn_kernel, inv_h=1.0 / H),
        out_shape=jax.ShapeDtypeStruct((B, S, H), h.dtype),
        grid=(B, S // t_s),
        in_specs=[
            pl.BlockSpec((1, t_s, H), lambda b, s: (b, s, 0)),
            _rep((H, inter)), _rep((1, inter)),
            _rep((inter, H)), _rep((1, H)),
            _rep((1, H)), _rep((1, H)),
        ],
        out_specs=pl.BlockSpec((1, t_s, H), lambda b, s: (b, s, 0)),
        compiler_params=_cparams("parallel", "parallel"),
    )(h, blk["ff_w1"], blk["ff_b1"], blk["ff_w2"], blk["ff_b2"],
      blk["ln_ff_g"], blk["ln_ff_b"])


def vocab_projection(x2d, w, b, *, tm_pref=512, tn_pref=512, tk_pref=512):
    """Tiled (M,N,K) matmul + bias; N is padded to a multiple of the N tile so
    tn never degenerates to 128 for real vocab sizes (lane-dense stores, full
    MXU width). Partials accumulate directly into the resident f32 output."""
    M, K = x2d.shape
    N = w.shape[1]
    tn = min(tn_pref, _round_up(N, 128))
    Np = _round_up(N, tn)
    if Np != N:
        w = jnp.pad(w, ((0, 0), (0, Np - N)))
        b = jnp.pad(b, (0, Np - N))
    b2 = b.reshape(1, Np).astype(jnp.float32)
    tm = _pick_tile(M, tm_pref, 8)
    tk = _pick_tile(K, tk_pref, 128)
    xb = x2d.astype(jnp.bfloat16)                 # bf16 MXU operand, halves x DMA
    out = pl.pallas_call(
        _fc_kernel,
        out_shape=jax.ShapeDtypeStruct((M, Np), jnp.float32),
        grid=(M // tm, Np // tn, K // tk),
        in_specs=[
            pl.BlockSpec((tm, tk), lambda i, j, k: (i, k)),
            pl.BlockSpec((tk, tn), lambda i, j, k: (k, j)),
            pl.BlockSpec((1, tn), lambda i, j, k: (0, j)),
        ],
        out_specs=pl.BlockSpec((tm, tn), lambda i, j, k: (i, j)),
        compiler_params=_cparams("parallel", "parallel", "arbitrary"),
    )(xb, w, b2)
    return out[:, :N] if Np != N else out


# ----------------------------------------------------------------------------
# Parameters (deterministic synthetic init — no checkpoint loading)
# ----------------------------------------------------------------------------
def _dense(key, fan_in, fan_out):
    k1, k2 = jax.random.split(key)
    return (jax.random.normal(k1, (fan_in, fan_out), jnp.float32) * 0.02,
            jax.random.normal(k2, (fan_out,), jnp.float32) * 0.02)


def init_decoder_params(key, cfg):
    H, I, V, L, nH = (cfg["hidden"], cfg["intermediate"], cfg["vocab"],
                      cfg["layers"], cfg["num_heads"])
    scale = 1.0 / math.sqrt(H // nH)   # folded into the Q projection weights
    bf = jnp.bfloat16
    ones = jnp.ones((1, H), jnp.float32)
    zeros = jnp.zeros((1, H), jnp.float32)
    blocks = []
    keys = jax.random.split(key, L + 1)
    for lk in keys[:L]:
        ks = jax.random.split(lk, 10)
        sqw, sqb = _dense(ks[0], H, H)
        skw, skb = _dense(ks[1], H, H)
        svw, svb = _dense(ks[2], H, H)
        sow, sob = _dense(ks[3], H, H)
        cqw, cqb = _dense(ks[4], H, H)
        ckw, ckb = _dense(ks[5], H, H)
        cvw, cvb = _dense(ks[6], H, H)
        cow, cob = _dense(ks[7], H, H)
        f1w, f1b = _dense(ks[8], H, I)
        f2w, f2b = _dense(ks[9], I, H)
        blocks.append({
            # self-attention: Q pre-scaled by 1/sqrt(Dh); fused KV; bf16 weights
            "sa_wq": (sqw * scale).astype(bf), "sa_bq": (sqb * scale).reshape(1, H),
            "sa_wkv": jnp.concatenate([skw, svw], axis=1).astype(bf),
            "sa_bkv": jnp.concatenate([skb, svb]).reshape(1, 2 * H),
            "sa_wo": sow.astype(bf), "sa_bo": sob.reshape(1, H),
            "ln_sa_g": ones, "ln_sa_b": zeros,
            # cross-attention: separate Q (pre-scaled), fused KV from cond_x
            "ca_wq": (cqw * scale).astype(bf), "ca_bq": (cqb * scale).reshape(1, H),
            "ca_wkv": jnp.concatenate([ckw, cvw], axis=1).astype(bf),
            "ca_bkv": jnp.concatenate([ckb, cvb]).reshape(1, 2 * H),
            "ca_wo": cow.astype(bf), "ca_bo": cob.reshape(1, H),
            "ln_ca_g": ones, "ln_ca_b": zeros,
            # feed-forward
            "ff_w1": f1w.astype(bf), "ff_b1": f1b.reshape(1, I),
            "ff_w2": f2w.astype(bf), "ff_b2": f2b.reshape(1, H),
            "ln_ff_g": ones, "ln_ff_b": zeros,
        })
    fcw, fcb = _dense(keys[L], H, V)
    return {"blocks": blocks, "fc": {"w": fcw.astype(bf), "b": fcb}}


# ----------------------------------------------------------------------------
# Decoder forward
# ----------------------------------------------------------------------------
def get_extended_attention_mask(attention_mask):
    if attention_mask is None:
        return None
    m = attention_mask
    if jnp.issubdtype(m.dtype, jnp.integer):
        neg = float(jnp.iinfo(m.dtype).min)       # matches torch.iinfo usage
    elif jnp.issubdtype(m.dtype, jnp.floating):
        neg = float(jnp.finfo(m.dtype).min)
    else:                                          # bool mask
        neg = float(jnp.finfo(jnp.float32).min)
    ext = m[:, None, :].astype(jnp.float32)        # (B, 1, Skv)
    return (1.0 - ext) * neg


def decoder_forward(params, x, cond_x, cond_mask, cfg):
    B, S, H = x.shape
    Skv = cond_x.shape[1]
    n_heads = cfg["num_heads"]
    t_s = _pick_tile(S, 256, 8)                    # query-row tile (bounds VMEM with S)

    add_mask = get_extended_attention_mask(cond_mask)
    if add_mask is None:
        add_mask = jnp.zeros((B, 1, Skv), jnp.float32)

    h = x
    for blk in params["blocks"]:
        # self-attention has attention_mask=None in the reference -> no mask add
        h = self_attention_block(h, blk, n_heads, t_s)
        h = cross_attention_block(h, cond_x, add_mask, blk, n_heads, t_s)
        h = ffn_block(h, blk, t_s)

    logits = vocab_projection(h.reshape(B * S, H), params["fc"]["w"], params["fc"]["b"])
    return logits.reshape(B, S, cfg["vocab"])


# ----------------------------------------------------------------------------
if __name__ == "__main__":
    cfg = {
        "layers": 2,        # decoder_config.num_hidden_layers
        "hidden": 32,       # arch_config.hidden_size
        "num_heads": 4,
        "intermediate": 64,
        "vocab": 50,        # arch_config.vocab_size
    }
    B, S, Skv = 2, 8, 8

    key = jax.random.PRNGKey(0)
    kp, kx, kc = jax.random.split(key, 3)

    params = init_decoder_params(kp, cfg)
    x = jax.random.normal(kx, (B, S, cfg["hidden"]), jnp.float32)
    cond_x = jax.random.normal(kc, (B, Skv, cfg["hidden"]), jnp.float32)
    # int attention mask (1 = attend, 0 = masked) — matches torch.iinfo usage
    cond_mask = jnp.array(
        [[1, 1, 1, 1, 1, 1, 1, 1],
         [1, 1, 1, 1, 1, 0, 0, 0]], dtype=jnp.int32)

    out = decoder_forward(params, x, cond_x, cond_mask, cfg)
    jax.block_until_ready(out)
    assert out.shape == (B, S, cfg["vocab"]), out.shape
    assert bool(jnp.all(jnp.isfinite(out)))
    print("KERNEL_OK")
</pallas_src>

<mosaic_0001>
module attributes {stable_mosaic.version = 11 : i64} {
  func.func @_self_attn_kernel(%arg0: i32, %arg1: i32, %arg2: memref<1x8x32xf32, #tpu.memory_space<vmem>>, %arg3: memref<1x8x32xf32, #tpu.memory_space<vmem>>, %arg4: memref<32x32xbf16, #tpu.memory_space<vmem>>, %arg5: memref<1x32xf32, #tpu.memory_space<vmem>>, %arg6: memref<32x64xbf16, #tpu.memory_space<vmem>>, %arg7: memref<1x64xf32, #tpu.memory_space<vmem>>, %arg8: memref<32x32xbf16, #tpu.memory_space<vmem>>, %arg9: memref<1x32xf32, #tpu.memory_space<vmem>>, %arg10: memref<1x32xf32, #tpu.memory_space<vmem>>, %arg11: memref<1x32xf32, #tpu.memory_space<vmem>>, %arg12: memref<1x8x32xf32, #tpu.memory_space<vmem>>, %arg13: memref<8x32xf32, #tpu.memory_space<vmem>>) attributes {dimension_semantics = [#tpu.dimension_semantics<parallel>, #tpu.dimension_semantics<parallel>], iteration_bounds = array<i64: 2, 1>, scalar_prefetch = 0 : i64, scratch_operands = 1 : i64, tpu.core_type = #tpu.core_type<tc>, window_params = [{transform_indices = @transform_0, window_bounds = array<i64: 1, 8, 32>}, {transform_indices = @transform_1, window_bounds = array<i64: 1, 8, 32>}, {pipeline_mode = #tpu.pipeline_mode<synchronous>, transform_indices = @transform_2, window_bounds = array<i64: 32, 32>}, {pipeline_mode = #tpu.pipeline_mode<synchronous>, transform_indices = @transform_3, window_bounds = array<i64: 1, 32>}, {pipeline_mode = #tpu.pipeline_mode<synchronous>, transform_indices = @transform_4, window_bounds = array<i64: 32, 64>}, {pipeline_mode = #tpu.pipeline_mode<synchronous>, transform_indices = @transform_5, window_bounds = array<i64: 1, 64>}, {pipeline_mode = #tpu.pipeline_mode<synchronous>, transform_indices = @transform_6, window_bounds = array<i64: 32, 32>}, {pipeline_mode = #tpu.pipeline_mode<synchronous>, transform_indices = @transform_7, window_bounds = array<i64: 1, 32>}, {pipeline_mode = #tpu.pipeline_mode<synchronous>, transform_indices = @transform_8, window_bounds = array<i64: 1, 32>}, {pipeline_mode = #tpu.pipeline_mode<synchronous>, transform_indices = @transform_9, window_bounds = array<i64: 1, 32>}, {transform_indices = @transform_10, window_bounds = array<i64: 1, 8, 32>}]} {
    %c0 = arith.constant 0 : index
    %c0_0 = arith.constant 0 : index
    %c0_1 = arith.constant 0 : index
    %0 = vector.load %arg2[%c0, %c0_0, %c0_1] : memref<1x8x32xf32, #tpu.memory_space<vmem>>, vector<1x8x32xf32>
    %1 = vector.shape_cast %0 : vector<1x8x32xf32> to vector<8x32xf32>
    %c0_2 = arith.constant 0 : index
    %c0_3 = arith.constant 0 : index
    %c0_4 = arith.constant 0 : index
    %2 = vector.load %arg3[%c0_2, %c0_3, %c0_4] : memref<1x8x32xf32, #tpu.memory_space<vmem>>, vector<1x8x32xf32>
    %3 = vector.shape_cast %2 : vector<1x8x32xf32> to vector<8x32xf32>
    %4 = arith.truncf %1 : vector<8x32xf32> to vector<8x32xbf16>
    %c0_5 = arith.constant 0 : index
    %c0_6 = arith.constant 0 : index
    %5 = vector.load %arg4[%c0_5, %c0_6] : memref<32x32xbf16, #tpu.memory_space<vmem>>, vector<32x32xbf16>
    %cst = arith.constant dense<0.000000e+00> : vector<8x32xf32>
    %6 = tpu.matmul %4, %5, %cst {dimension_numbers = #tpu.dot_dimension_numbers<[1], [0], [0], [1], [0, 0, 1, 1], [], []>} : vector<8x32xbf16>, vector<32x32xbf16>, vector<8x32xf32> -> vector<8x32xf32>
    %c0_7 = arith.constant 0 : index
    %c0_8 = arith.constant 0 : index
    %7 = vector.load %arg5[%c0_7, %c0_8] : memref<1x32xf32, #tpu.memory_space<vmem>>, vector<1x32xf32>
    %8 = vector.broadcast %7 : vector<1x32xf32> to vector<8x32xf32>
    %9 = arith.addf %6, %8 : vector<8x32xf32>
    %10 = arith.truncf %3 : vector<8x32xf32> to vector<8x32xbf16>
    %c0_9 = arith.constant 0 : index
    %c0_10 = arith.constant 0 : index
    %11 = vector.load %arg6[%c0_9, %c0_10] : memref<32x64xbf16, #tpu.memory_space<vmem>>, vector<32x64xbf16>
    %cst_11 = arith.constant dense<0.000000e+00> : vector<8x64xf32>
    %12 = tpu.matmul %10, %11, %cst_11 {dimension_numbers = #tpu.dot_dimension_numbers<[1], [0], [0], [1], [0, 0, 1, 1], [], []>} : vector<8x32xbf16>, vector<32x64xbf16>, vector<8x64xf32> -> vector<8x64xf32>
    %c0_12 = arith.constant 0 : index
    %c0_13 = arith.constant 0 : index
    %13 = vector.load %arg7[%c0_12, %c0_13] : memref<1x64xf32, #tpu.memory_space<vmem>>, vector<1x64xf32>
    %14 = vector.broadcast %13 : vector<1x64xf32> to vector<8x64xf32>
    %15 = arith.addf %12, %14 : vector<8x64xf32>
    %16 = vector.extract_strided_slice %15 {offsets = [0, 0], sizes = [8, 32], strides = [1, 1]} : vector<8x64xf32> to vector<8x32xf32>
    %17 = vector.extract_strided_slice %15 {offsets = [0, 32], sizes = [8, 32], strides = [1, 1]} : vector<8x64xf32> to vector<8x32xf32>
    %18 = arith.truncf %9 : vector<8x32xf32> to vector<8x32xbf16>
    %19 = arith.truncf %16 : vector<8x32xf32> to vector<8x32xbf16>
    %20 = arith.truncf %17 : vector<8x32xf32> to vector<8x32xbf16>
    %21 = vector.extract_strided_slice %18 {offsets = [0, 0], sizes = [8, 8], strides = [1, 1]} : vector<8x32xbf16> to vector<8x8xbf16>
    %22 = vector.extract_strided_slice %19 {offsets = [0, 0], sizes = [8, 8], strides = [1, 1]} : vector<8x32xbf16> to vector<8x8xbf16>
    "tpu.trace_start"() <{level = 10 : i32, message = "qd,kd->qk"}> : () -> ()
    %cst_14 = arith.constant dense<0.000000e+00> : vector<8x8xf32>
    %23 = tpu.matmul %21, %22, %cst_14 {dimension_numbers = #tpu.dot_dimension_numbers<[1], [1], [0], [0], [0, 0, 1, 0], [], []>} : vector<8x8xbf16>, vector<8x8xbf16>, vector<8x8xf32> -> vector<8x8xf32>
    "tpu.trace_stop"() : () -> ()
    %cst_15 = arith.constant dense<0xFF800000> : vector<8xf32>
    %24 = vector.multi_reduction <maximumf>, %23, %cst_15 [1] : vector<8x8xf32> to vector<8xf32>
    %25 = vector.shape_cast %24 : vector<8xf32> to vector<8x1xf32>
    %26 = vector.broadcast %25 : vector<8x1xf32> to vector<8x8xf32>
    %27 = arith.subf %23, %26 : vector<8x8xf32>
    %28 = math.exp %27 : vector<8x8xf32>
    %cst_16 = arith.constant dense<0.000000e+00> : vector<8xf32>
    %29 = vector.multi_reduction <add>, %28, %cst_16 [1] : vector<8x8xf32> to vector<8xf32>
    %30 = vector.shape_cast %29 : vector<8xf32> to vector<8x1xf32>
    %31 = arith.truncf %28 : vector<8x8xf32> to vector<8x8xbf16>
    %32 = vector.extract_strided_slice %20 {offsets = [0, 0], sizes = [8, 8], strides = [1, 1]} : vector<8x32xbf16> to vector<8x8xbf16>
    "tpu.trace_start"() <{level = 10 : i32, message = "qk,kd->qd"}> : () -> ()
    %cst_17 = arith.constant dense<0.000000e+00> : vector<8x8xf32>
    %33 = tpu.matmul %31, %32, %cst_17 {dimension_numbers = #tpu.dot_dimension_numbers<[1], [0], [0], [1], [0, 0, 1, 1], [], []>} : vector<8x8xbf16>, vector<8x8xbf16>, vector<8x8xf32> -> vector<8x8xf32>
    "tpu.trace_stop"() : () -> ()
    %34 = tpu.reciprocal %30 {approx = true} : vector<8x1xf32> -> vector<8x1xf32>
    %35 = vector.broadcast %34 : vector<8x1xf32> to vector<8x8xf32>
    %36 = arith.mulf %33, %35 : vector<8x8xf32>
    %c0_18 = arith.constant 0 : index
    %c0_19 = arith.constant 0 : index
    %37 = vector.load %arg13[%c0_18, %c0_19] : memref<8x32xf32, #tpu.memory_space<vmem>>, vector<8x8xf32>
    tpu.vector_store %arg13[%c0_18, %c0_19], %36 {strides = array<i32>} : memref<8x32xf32, #tpu.memory_space<vmem>>, vector<8x8xf32>,
    %38 = vector.extract_strided_slice %18 {offsets = [0, 8], sizes = [8, 8], strides = [1, 1]} : vector<8x32xbf16> to vector<8x8xbf16>
    %39 = vector.extract_strided_slice %19 {offsets = [0, 8], sizes = [8, 8], strides = [1, 1]} : vector<8x32xbf16> to vector<8x8xbf16>
    "tpu.trace_start"() <{level = 10 : i32, message = "qd,kd->qk"}> : () -> ()
    %cst_20 = arith.constant dense<0.000000e+00> : vector<8x8xf32>
    %40 = tpu.matmul %38, %39, %cst_20 {dimension_numbers = #tpu.dot_dimension_numbers<[1], [1], [0], [0], [0, 0, 1, 0], [], []>} : vector<8x8xbf16>, vector<8x8xbf16>, vector<8x8xf32> -> vector<8x8xf32>
    "tpu.trace_stop"() : () -> ()
    %cst_21 = arith.constant dense<0xFF800000> : vector<8xf32>
    %41 = vector.multi_reduction <maximumf>, %40, %cst_21 [1] : vector<8x8xf32> to vector<8xf32>
    %42 = vector.shape_cast %41 : vector<8xf32> to vector<8x1xf32>
    %43 = vector.broadcast %42 : vector<8x1xf32> to vector<8x8xf32>
    %44 = arith.subf %40, %43 : vector<8x8xf32>
    %45 = math.exp %44 : vector<8x8xf32>
    %cst_22 = arith.constant dense<0.000000e+00> : vector<8xf32>
    %46 = vector.multi_reduction <add>, %45, %cst_22 [1] : vector<8x8xf32> to vector<8xf32>
    %47 = vector.shape_cast %46 : vector<8xf32> to vector<8x1xf32>
    %48 = arith.truncf %45 : vector<8x8xf32> to vector<8x8xbf16>
    %49 = vector.extract_strided_slice %20 {offsets = [0, 8], sizes = [8, 8], strides = [1, 1]} : vector<8x32xbf16> to vector<8x8xbf16>
    "tpu.trace_start"() <{level = 10 : i32, message = "qk,kd->qd"}> : () -> ()
    %cst_23 = arith.constant dense<0.000000e+00> : vector<8x8xf32>
    %50 = tpu.matmul %48, %49, %cst_23 {dimension_numbers = #tpu.dot_dimension_numbers<[1], [0], [0], [1], [0, 0, 1, 1], [], []>} : vector<8x8xbf16>, vector<8x8xbf16>, vector<8x8xf32> -> vector<8x8xf32>
    "tpu.trace_stop"() : () -> ()
    %51 = tpu.reciprocal %47 {approx = true} : vector<8x1xf32> -> vector<8x1xf32>
    %52 = vector.broadcast %51 : vector<8x1xf32> to vector<8x8xf32>
    %53 = arith.mulf %50, %52 : vector<8x8xf32>
    %c0_24 = arith.constant 0 : index
    %c8 = arith.constant 8 : index
    %54 = vector.load %arg13[%c0_24, %c8] : memref<8x32xf32, #tpu.memory_space<vmem>>, vector<8x8xf32>
    tpu.vector_store %arg13[%c0_24, %c8], %53 {strides = array<i32>} : memref<8x32xf32, #tpu.memory_space<vmem>>, vector<8x8xf32>,
    %55 = vector.extract_strided_slice %18 {offsets = [0, 16], sizes = [8, 8], strides = [1, 1]} : vector<8x32xbf16> to vector<8x8xbf16>
    %56 = vector.extract_strided_slice %19 {offsets = [0, 16], sizes = [8, 8], strides = [1, 1]} : vector<8x32xbf16> to vector<8x8xbf16>
    "tpu.trace_start"() <{level = 10 : i32, message = "qd,kd->qk"}> : () -> ()
    %cst_25 = arith.constant dense<0.000000e+00> : vector<8x8xf32>
    %57 = tpu.matmul %55, %56, %cst_25 {dimension_numbers = #tpu.dot_dimension_numbers<[1], [1], [0], [0], [0, 0, 1, 0], [], []>} : vector<8x8xbf16>, vector<8x8xbf16>, vector<8x8xf32> -> vector<8x8xf32>
    "tpu.trace_stop"() : () -> ()
    %cst_26 = arith.constant dense<0xFF800000> : vector<8xf32>
    %58 = vector.multi_reduction <maximumf>, %57, %cst_26 [1] : vector<8x8xf32> to vector<8xf32>
    %59 = vector.shape_cast %58 : vector<8xf32> to vector<8x1xf32>
    %60 = vector.broadcast %59 : vector<8x1xf32> to vector<8x8xf32>
    %61 = arith.subf %57, %60 : vector<8x8xf32>
    %62 = math.exp %61 : vector<8x8xf32>
    %cst_27 = arith.constant dense<0.000000e+00> : vector<8xf32>
    %63 = vector.multi_reduction <add>, %62, %cst_27 [1] : vector<8x8xf32> to vector<8xf32>
    %64 = vector.shape_cast %63 : vector<8xf32> to vector<8x1xf32>
    %65 = arith.truncf %62 : vector<8x8xf32> to vector<8x8xbf16>
    %66 = vector.extract_strided_slice %20 {offsets = [0, 16], sizes = [8, 8], strides = [1, 1]} : vector<8x32xbf16> to vector<8x8xbf16>
    "tpu.trace_start"() <{level = 10 : i32, message = "qk,kd->qd"}> : () -> ()
    %cst_28 = arith.constant dense<0.000000e+00> : vector<8x8xf32>
    %67 = tpu.matmul %65, %66, %cst_28 {dimension_numbers = #tpu.dot_dimension_numbers<[1], [0], [0], [1], [0, 0, 1, 1], [], []>} : vector<8x8xbf16>, vector<8x8xbf16>, vector<8x8xf32> -> vector<8x8xf32>
    "tpu.trace_stop"() : () -> ()
    %68 = tpu.reciprocal %64 {approx = true} : vector<8x1xf32> -> vector<8x1xf32>
    %69 = vector.broadcast %68 : vector<8x1xf32> to vector<8x8xf32>
    %70 = arith.mulf %67, %69 : vector<8x8xf32>
    %c0_29 = arith.constant 0 : index
    %c16 = arith.constant 16 : index
    %71 = vector.load %arg13[%c0_29, %c16] : memref<8x32xf32, #tpu.memory_space<vmem>>, vector<8x8xf32>
    tpu.vector_store %arg13[%c0_29, %c16], %70 {strides = array<i32>} : memref<8x32xf32, #tpu.memory_space<vmem>>, vector<8x8xf32>,
    %72 = vector.extract_strided_slice %18 {offsets = [0, 24], sizes = [8, 8], strides = [1, 1]} : vector<8x32xbf16> to vector<8x8xbf16>
    %73 = vector.extract_strided_slice %19 {offsets = [0, 24], sizes = [8, 8], strides = [1, 1]} : vector<8x32xbf16> to vector<8x8xbf16>
    "tpu.trace_start"() <{level = 10 : i32, message = "qd,kd->qk"}> : () -> ()
    %cst_30 = arith.constant dense<0.000000e+00> : vector<8x8xf32>
    %74 = tpu.matmul %72, %73, %cst_30 {dimension_numbers = #tpu.dot_dimension_numbers<[1], [1], [0], [0], [0, 0, 1, 0], [], []>} : vector<8x8xbf16>, vector<8x8xbf16>, vector<8x8xf32> -> vector<8x8xf32>
    "tpu.trace_stop"() : () -> ()
    %cst_31 = arith.constant dense<0xFF800000> : vector<8xf32>
    %75 = vector.multi_reduction <maximumf>, %74, %cst_31 [1] : vector<8x8xf32> to vector<8xf32>
    %76 = vector.shape_cast %75 : vector<8xf32> to vector<8x1xf32>
    %77 = vector.broadcast %76 : vector<8x1xf32> to vector<8x8xf32>
    %78 = arith.subf %74, %77 : vector<8x8xf32>
    %79 = math.exp %78 : vector<8x8xf32>
    %cst_32 = arith.constant dense<0.000000e+00> : vector<8xf32>
    %80 = vector.multi_reduction <add>, %79, %cst_32 [1] : vector<8x8xf32> to vector<8xf32>
    %81 = vector.shape_cast %80 : vector<8xf32> to vector<8x1xf32>
    %82 = arith.truncf %79 : vector<8x8xf32> to vector<8x8xbf16>
    %83 = vector.extract_strided_slice %20 {offsets = [0, 24], sizes = [8, 8], strides = [1, 1]} : vector<8x32xbf16> to vector<8x8xbf16>
    "tpu.trace_start"() <{level = 10 : i32, message = "qk,kd->qd"}> : () -> ()
    %cst_33 = arith.constant dense<0.000000e+00> : vector<8x8xf32>
    %84 = tpu.matmul %82, %83, %cst_33 {dimension_numbers = #tpu.dot_dimension_numbers<[1], [0], [0], [1], [0, 0, 1, 1], [], []>} : vector<8x8xbf16>, vector<8x8xbf16>, vector<8x8xf32> -> vector<8x8xf32>
    "tpu.trace_stop"() : () -> ()
    %85 = tpu.reciprocal %81 {approx = true} : vector<8x1xf32> -> vector<8x1xf32>
    %86 = vector.broadcast %85 : vector<8x1xf32> to vector<8x8xf32>
    %87 = arith.mulf %84, %86 : vector<8x8xf32>
    %c0_34 = arith.constant 0 : index
    %c24 = arith.constant 24 : index
    %88 = vector.load %arg13[%c0_34, %c24] : memref<8x32xf32, #tpu.memory_space<vmem>>, vector<8x8xf32>
    tpu.vector_store %arg13[%c0_34, %c24], %87 {strides = array<i32>} : memref<8x32xf32, #tpu.memory_space<vmem>>, vector<8x8xf32>,
    %c0_35 = arith.constant 0 : index
    %c0_36 = arith.constant 0 : index
    %89 = vector.load %arg13[%c0_35, %c0_36] : memref<8x32xf32, #tpu.memory_space<vmem>>, vector<8x32xf32>
    %90 = arith.truncf %89 : vector<8x32xf32> to vector<8x32xbf16>
    %c0_37 = arith.constant 0 : index
    %c0_38 = arith.constant 0 : index
    %91 = vector.load %arg8[%c0_37, %c0_38] : memref<32x32xbf16, #tpu.memory_space<vmem>>, vector<32x32xbf16>
    %cst_39 = arith.constant dense<0.000000e+00> : vector<8x32xf32>
    %92 = tpu.matmul %90, %91, %cst_39 {dimension_numbers = #tpu.dot_dimension_numbers<[1], [0], [0], [1], [0, 0, 1, 1], [], []>} : vector<8x32xbf16>, vector<32x32xbf16>, vector<8x32xf32> -> vector<8x32xf32>
    %c0_40 = arith.constant 0 : index
    %c0_41 = arith.constant 0 : index
    %93 = vector.load %arg9[%c0_40, %c0_41] : memref<1x32xf32, #tpu.memory_space<vmem>>, vector<1x32xf32>
    %94 = vector.broadcast %93 : vector<1x32xf32> to vector<8x32xf32>
    %95 = arith.addf %92, %94 : vector<8x32xf32>
    %c0_42 = arith.constant 0 : index
    %c0_43 = arith.constant 0 : index
    %96 = vector.load %arg10[%c0_42, %c0_43] : memref<1x32xf32, #tpu.memory_space<vmem>>, vector<1x32xf32>
    %c0_44 = arith.constant 0 : index
    %c0_45 = arith.constant 0 : index
    %97 = vector.load %arg11[%c0_44, %c0_45] : memref<1x32xf32, #tpu.memory_space<vmem>>, vector<1x32xf32>
    %98 = arith.addf %95, %1 : vector<8x32xf32>
    %cst_46 = arith.constant dense<0.000000e+00> : vector<8xf32>
    %99 = vector.multi_reduction <add>, %98, %cst_46 [1] : vector<8x32xf32> to vector<8xf32>
    %100 = vector.shape_cast %99 : vector<8xf32> to vector<8x1xf32>
    %cst_47 = arith.constant 3.125000e-02 : f32
    %101 = vector.broadcast %cst_47 : f32 to vector<8x1xf32>
    %102 = arith.mulf %100, %101 : vector<8x1xf32>
    %103 = vector.broadcast %102 : vector<8x1xf32> to vector<8x32xf32>
    %104 = arith.subf %98, %103 : vector<8x32xf32>
    %105 = arith.mulf %104, %104 : vector<8x32xf32>
    %cst_48 = arith.constant dense<0.000000e+00> : vector<8xf32>
    %106 = vector.multi_reduction <add>, %105, %cst_48 [1] : vector<8x32xf32> to vector<8xf32>
    %107 = vector.shape_cast %106 : vector<8xf32> to vector<8x1xf32>
    %cst_49 = arith.constant 3.125000e-02 : f32
    %108 = vector.broadcast %cst_49 : f32 to vector<8x1xf32>
    %109 = arith.mulf %107, %108 : vector<8x1xf32>
    %cst_50 = arith.constant 9.99999996E-13 : f32
    %110 = vector.broadcast %cst_50 : f32 to vector<8x1xf32>
    %111 = arith.addf %109, %110 : vector<8x1xf32>
    %112 = math.rsqrt %111 : vector<8x1xf32>
    %113 = vector.broadcast %112 : vector<8x1xf32> to vector<8x32xf32>
    %114 = arith.mulf %104, %113 : vector<8x32xf32>
    %115 = vector.broadcast %96 : vector<1x32xf32> to vector<8x32xf32>
    %116 = arith.mulf %114, %115 : vector<8x32xf32>
    %117 = vector.broadcast %97 : vector<1x32xf32> to vector<8x32xf32>
    %118 = arith.addf %116, %117 : vector<8x32xf32>
    %c0_51 = arith.constant 0 : index
    %c0_52 = arith.constant 0 : index
    %c0_53 = arith.constant 0 : index
    %119 = vector.load %arg12[%c0_51, %c0_52, %c0_53] : memref<1x8x32xf32, #tpu.memory_space<vmem>>, vector<1x8x32xf32>
    %120 = vector.shape_cast %119 : vector<1x8x32xf32> to vector<8x32xf32>
    %121 = vector.shape_cast %118 : vector<8x32xf32> to vector<1x8x32xf32>
    tpu.vector_store %arg12[%c0_51, %c0_52, %c0_53], %121 {strides = array<i32>} : memref<1x8x32xf32, #tpu.memory_space<vmem>>, vector<1x8x32xf32>,
    return
  }
  func.func @transform_0(%arg0: i32, %arg1: i32) -> (i32, i32, i32) {
    %c0_i32 = arith.constant 0 : i32
    %c0_i32_0 = arith.constant 0 : i32
    return %arg0, %arg1, %c0_i32 : i32, i32, i32
  }
  func.func @transform_1(%arg0: i32, %arg1: i32) -> (i32, i32, i32) {
    %c0_i32 = arith.constant 0 : i32
    %c0_i32_0 = arith.constant 0 : i32
    %c0_i32_1 = arith.constant 0 : i32
    return %arg0, %c0_i32, %c0_i32_0 : i32, i32, i32
  }
  func.func @transform_2(%arg0: i32, %arg1: i32) -> (i32, i32) {
    %c0_i32 = arith.constant 0 : i32
    %c0_i32_0 = arith.constant 0 : i32
    %c0_i32_1 = arith.constant 0 : i32
    return %c0_i32, %c0_i32_0 : i32, i32
  }
  func.func @transform_3(%arg0: i32, %arg1: i32) -> (i32, i32) {
    %c0_i32 = arith.constant 0 : i32
    %c0_i32_0 = arith.constant 0 : i32
    %c0_i32_1 = arith.constant 0 : i32
    return %c0_i32, %c0_i32_0 : i32, i32
  }
  func.func @transform_4(%arg0: i32, %arg1: i32) -> (i32, i32) {
    %c0_i32 = arith.constant 0 : i32
    %c0_i32_0 = arith.constant 0 : i32
    %c0_i32_1 = arith.constant 0 : i32
    return %c0_i32, %c0_i32_0 : i32, i32
  }
  func.func @transform_5(%arg0: i32, %arg1: i32) -> (i32, i32) {
    %c0_i32 = arith.constant 0 : i32
    %c0_i32_0 = arith.constant 0 : i32
    %c0_i32_1 = arith.constant 0 : i32
    return %c0_i32, %c0_i32_0 : i32, i32
  }
  func.func @transform_6(%arg0: i32, %arg1: i32) -> (i32, i32) {
    %c0_i32 = arith.constant 0 : i32
    %c0_i32_0 = arith.constant 0 : i32
    %c0_i32_1 = arith.constant 0 : i32
    return %c0_i32, %c0_i32_0 : i32, i32
  }
  func.func @transform_7(%arg0: i32, %arg1: i32) -> (i32, i32) {
    %c0_i32 = arith.constant 0 : i32
    %c0_i32_0 = arith.constant 0 : i32
    %c0_i32_1 = arith.constant 0 : i32
    return %c0_i32, %c0_i32_0 : i32, i32
  }
  func.func @transform_8(%arg0: i32, %arg1: i32) -> (i32, i32) {
    %c0_i32 = arith.constant 0 : i32
    %c0_i32_0 = arith.constant 0 : i32
    %c0_i32_1 = arith.constant 0 : i32
    return %c0_i32, %c0_i32_0 : i32, i32
  }
  func.func @transform_9(%arg0: i32, %arg1: i32) -> (i32, i32) {
    %c0_i32 = arith.constant 0 : i32
    %c0_i32_0 = arith.constant 0 : i32
    %c0_i32_1 = arith.constant 0 : i32
    return %c0_i32, %c0_i32_0 : i32, i32
  }
  func.func @transform_10(%arg0: i32, %arg1: i32) -> (i32, i32, i32) {
    %c0_i32 = arith.constant 0 : i32
    %c0_i32_0 = arith.constant 0 : i32
    return %arg0, %arg1, %c0_i32 : i32, i32, i32
  }
}

</mosaic_0001>

<bundles_post_ra>
// kernel: tpu_custom_call.1
= control target key start
LH: loop header
LB: loop body
LE: loop exit
PB: predicated region body
PF: predicated region fallthrough
CT: control target
= control target key end

     0   :  { %s2200_s0 = inlined_call_operand.hbm [shape: f32[2,8,32], index: 0, kind: input, shape index: {}]   ;;  %s2201_s1 = inlined_call_operand.hbm [shape: f32[2,8,32], index: 1, kind: input, shape index: {}]   ;;  %s2202_s2 = inlined_call_operand.hbm [shape: bf16[32,32], index: 2, kind: input, shape index: {}]   ;;  %s2203_s3 = inlined_call_operand.vmem [shape: f32[1,32], index: 3, kind: input, shape index: {}]   ;;  %s2204_s4 = inlined_call_operand.hbm [shape: bf16[32,64], index: 4, kind: input, shape index: {}]   ;;  %s2205_s5 = inlined_call_operand.vmem [shape: f32[1,64], index: 5, kind: input, shape index: {}]   ;;  %s2206_s6 = inlined_call_operand.hbm [shape: bf16[32,32], index: 6, kind: input, shape index: {}]   ;;  %s2207_s7 = inlined_call_operand.vmem [shape: f32[1,32], index: 7, kind: input, shape index: {}]   ;;  %s2208_s8 = inlined_call_operand.vmem [shape: f32[1,32], index: 8, kind: input, shape index: {}]   ;;  %s2209_s9 = inlined_call_operand.vmem [shape: f32[1,32], index: 9, kind: input, shape index: {}]   ;;  %s2210_s10 = inlined_call_operand.hbm [shape: f32[2,8,32], index: 10, kind: output, shape index: {}]  }
   0x1   :  { %2217 = sst [smem:[#allocation21_spill]] %s2200_s0 }
   0x2   :  { %2218 = sst [smem:[#allocation22_spill]] %s2202_s2 }
   0x3   :  { %2219 = sst [smem:[#allocation23_spill]] %s2204_s4 }
   0x4   :  { %2220 = sst [smem:[#allocation24_spill]] %s2206_s6 }
   0x5   :  { %2221 = sst [smem:[#allocation25_spill]] %s2210_s10 }
   0x6   :  { %15 = vsyncpa [#allocation4], 0 }
   0x7   :  { %17 = vsyncpa [#allocation4 + $0x1], 0 }
   0x8   :  { %18 = vsyncpa [#allocation7], 0 }
   0x9   :  { %20 = vsyncpa [#allocation7 + $0x1], 0 }
   0xa   :  { %21 = vsyncpa [#allocation10], 0 }
   0xb   :  { %22 = vsyncpa [#allocation5], 0 }
   0xc   :  { %24 = vsyncpa [#allocation5 + $0x1], 0  ;;  %s1896_s13 = smov 0   ;;  %s1898_s14 = smov 0  }
   0xd   :  { %s1900_s15 = smov 0   ;;  %s1902_s16 = smov 0  }
   0xe   :  { %s1904_s17 = smov 0   ;;  %s1906_s18 = smov 0  }
   0xf LB: > { %2222 = sst [smem:[#allocation18_spill]] %s1799_s13  ;;  %s1927_s19 = sadd.s32 4294967295, %s1819_s18   ;;  %s1819_s18 = sphi %s1906_s18, %s30_s18   ;;  %s1815_s17 = sphi %s1904_s17, %s2251_s17   ;;  %s1811_s16 = sphi %s1902_s16, %s2250_s16   ;;  %s1807_s15 = sphi %s1900_s15, %s2249_s15   ;;  %s1803_s14 = sphi %s1898_s14, %s2248_s14   ;;  %s1799_s13 = sphi %s1896_s13, %s2247_s13  }
  0x10   : > { %s1317_s20 = sadd.s32 4294967294, %s1819_s18   ;;  %p64_p0 = scmp.ne.s32.totalorder %s1803_s14, %s1799_s13 }
  0x11   : > { %p2211_p1 = scmp.eq.s32.totalorder %s1927_s19, 0  ;;  %p290_p3 = scmp.eq.s32.totalorder %s1317_s20, 1 }
  0x12   : > { %p1318_p5 = scmp.ge.s32.totalorder %s1819_s18, 1  ;;  %p297_p7 = scmp.lt.s32.totalorder %s1819_s18, 3 }
  0x13   : > { %p1936_p4 = por %p2211_p1, %p64_p0  ;;  %p1941_p6 = por %p290_p3, %p64_p0 }
  0x14   : > { %p1946_p8 = pnand %p1318_p5, %p297_p7  ;;  %s1821_s24 = smov [#allocation8]  }
  0x15   : > { %s2223_s21 = scalar_select %p1936_p4, 1, 0 }
  0x16   : > { %s2224_s22 = scalar_select %p1941_p6, 1, 0 }
  0x17   : > { %s309_s25 = sshll.u32 %s1821_s24, 4  ;;  %p1475_p9 = pneg %p1946_p8  ;;  %s310_s25 = int_to_ptr.vmem [resolvable:$true] %s309_s25 }
  0x18   : > { %2225 = sst [smem:[#allocation19_spill]] %s2224_s22  ;;  %s1822_s27 = smov [#allocation9]  }
  0x19   : > { %p1955_p11 = pnand %p1475_p9, %p2211_p1  ;;  %s325_s28 = sshll.u32 %s1822_s27, 4  ;;  %s326_s28 = int_to_ptr.vmem [resolvable:$true] %s325_s28 }
  0x1a   : > { %s1823_s29 = smov [#allocation11]   ;;  %s1604_s11 = scalar_lea.vmem %s310_s25, 256 }
  0x1b   : > { %s341_s30 = sshll.u32 %s1823_s29, 4  ;;  %p1595_p12 = pneg %p1955_p11  ;;  %s342_s30 = int_to_ptr.vmem [resolvable:$true] %s341_s30 }
  0x1c   : > { %p1605_p13 = scmp.ne.s32.totalorder %s310_s25, %s1604_s11  ;;  %p1612_p5 = scmp.lt.s32.totalorder %s310_s25, %s310_s25 }
  0x1d   : > { %p1613_p7 = scmp.lt.s32.totalorder %s1604_s11, %s1604_s11 }
  0x1e   : > { %p1607_p0 = pnand %p1605_p13, %p1595_p12 }
  0x1f   : > { %p1614_p9 = por %p1613_p7, %p1612_p5 }
  0x20   : > { %p1608_p3 = pneg %p1607_p0 }
  0x22   : > { %p1615_p10 = pnand %p1614_p9, %p1608_p3 }
  0x24   : > { %1618 = shalt.err (!%p1615_p10)
}
  0x25   : > { %s1824_s12 = smov 64   ;;  %s1825_s20 = smov 4  }
  0x26   : > { %s2228_s2 = sld [smem:[#allocation22_spill]]  ;;  %s1630_s29 = scalar_lea.vmem %s326_s28, 256 }
  0x27   : > { %p1631_p1 = scmp.ne.s32.totalorder %s326_s28, %s1630_s29  ;;  %p1638_p2 = scmp.lt.s32.totalorder %s326_s28, %s326_s28 }
  0x28   : > { %p1639_p6 = scmp.lt.s32.totalorder %s1630_s29, %s1630_s29 }
  0x29   : > { %p1633_p13 = pnand %p1631_p1, %p1595_p12 }
  0x2a   : > { %p1640_p5 = por %p1639_p6, %p1638_p2 }
  0x2b   : > { %p1634_p0 = pneg %p1633_p13 }
  0x2c   : > { %1478 = dma.hbm_to_vmem [thread:$0]  (!%p1955_p11), %s2228_s2, 256, %s310_s25, [#allocation7], %s1824_s12, %s1824_s12, %s1825_s20  }
  0x2d   : > { %p1641_p3 = pnand %p1640_p5, %p1634_p0 }
  0x2f   : > { %1644 = shalt.err (!%p1641_p3)
}
  0x30   : > { %s2229_s4 = sld [smem:[#allocation23_spill]]  ;;  %s1656_s25 = scalar_lea.vmem %s342_s30, 256 }
  0x31   : > { %p1657_p10 = scmp.ne.s32.totalorder %s342_s30, %s1656_s25  ;;  %p1664_p9 = scmp.lt.s32.totalorder %s342_s30, %s342_s30 }
  0x32   : > { %p1665_p13 = scmp.lt.s32.totalorder %s1656_s25, %s1656_s25 }
  0x33   : > { %p1659_p7 = pnand %p1657_p10, %p1595_p12 }
  0x34   : > { %p1666_p4 = por %p1665_p13, %p1664_p9 }
  0x35   : > { %p1660_p1 = pneg %p1659_p7 }
  0x36   : > { %1481 = dma.hbm_to_vmem [thread:$0]  (!%p1955_p11), %s2229_s4, 256, %s326_s28, [#allocation10], %s1824_s12, %s1824_s12, %s1825_s20  }
  0x37   : > { %p1667_p2 = pnand %p1666_p4, %p1660_p1 }
  0x39   : > { %1670 = shalt.err (!%p1667_p2)
}
  0x3a   : > { %s2230_s6 = sld [smem:[#allocation24_spill]]  ;;  %s51_s22 = sadd.s32 1, %s1807_s15 }
  0x3b   : > { %s42_s28 = sadd.s32 1, %s1815_s17  ;;  %p58_p4 = scmp.ne.s32.totalorder %s1807_s15, %s1803_s14 }
  0x3c   : > { %p44_p6 = scmp.ge.s32.totalorder %s42_s28, 2  ;;  %p59_p12 = scmp.eq.s32.totalorder %s1819_s18, 0 }
  0x3d   : > { %p2231_p0 = scmp.eq.s32.totalorder %s1927_s19, 1  ;;  %p1499_p3 = scmp.lt.s32.totalorder %s1819_s18, 2 }
  0x3e   : > { %s2253_s28 = smov (%p44_p6, %s42_s28), 0  ;;  %p60_p10 = por %p59_p12, %p58_p4 }
  0x3f   : > { %p1992_p5 = por %p2231_p0, %p58_p4  ;;  %2233 = sst [smem:[#allocation20_spill]] %s2253_s28 }
  0x40   : > { %1484 = dma.hbm_to_vmem [thread:$0]  (!%p1955_p11), %s2230_s6, 256, %s342_s30, [#allocation10], %s1824_s12, %s1824_s12, %s1825_s20  }
  0x41   : > { %s364_s29 = sand.u32 1, %s1807_s15   ;;  %s46_s11 = ssub.s32 %s1815_s17, %s2253_s28 }
  0x42   : > { %p49_p11 = scmp.eq.s32.totalorder %s46_s11, 0  ;;  %s1323_s30 = sshll.u32 %s364_s29, 3 }
  0x43   : > { %s1324_s12 = sshll.u32 %s1815_s17, 7  ;;  %s2234_s0 = sld [smem:[#allocation21_spill]] }
  0x44   : > { %s2004_s20 = scalar_select %p49_p11, %s1807_s15, %s51_s22  }
  0x45   : > { %s368_s2 = scalar_lea.vmem [#allocation3], %s1323_s30  ;;  %p2011_p7 = pnand %p1499_p3, %p60_p10 }
  0x46   : > { %s376_s4 = sshll.u32 %s368_s2, 4  ;;  %s2018_s11 = scalar_lea.hbm %s2201_s1, %s1324_s12  ;;  %s377_s4 = int_to_ptr.vmem [resolvable:$true] %s376_s4 }
  0x47   : > { %s383_s22 = sand.u32 1, %s1819_s18   ;;  %s365_s28 = scalar_lea.sflag [#allocation4], %s364_s29 }
  0x48   : > { %p1673_p1 = pneg %p2011_p7  ;;  %s1684_s25 = scalar_lea.vmem %s377_s4, 128 }
  0x49   : > { %s374_s27 = scalar_lea.hbm %s2234_s0, %s1324_s12  ;;  %p1685_p9 = scmp.ne.s32.totalorder %s377_s4, %s1684_s25 }
  0x4a   : > { %s1826_s2 = smov [#allocation3]  }
  0x4b   : > { %p1687_p13 = pnand %p1685_p9, %p1673_p1  ;;  %s1689_s24 = sshll.u32 %s1826_s2, 4  ;;  %s1690_s24 = int_to_ptr.vmem [resolvable:$false] %s1689_s24 }
  0x4c   : > { %s1691_s0 = scalar_lea.vmem %s1690_s24, 256  ;;  %p1692_p4 = scmp.lt.s32.totalorder %s377_s4, %s1690_s24 }
  0x4d   : > { %p1688_p2 = pneg %p1687_p13  ;;  %p1693_p6 = scmp.lt.s32.totalorder %s1691_s0, %s1684_s25 }
  0x4f   : > { %p1694_p12 = por %p1693_p6, %p1692_p4 }
  0x51   : > { %p1695_p0 = pnand %p1694_p12, %p1688_p2 }
  0x53   : > { %1698 = shalt.err (!%p1695_p0)
}
  0x54   : > { %1488 = dma.hbm_to_vmem [thread:$0]  (!%p2011_p7), %s374_s27, 128, %s377_s4, %s365_s28  }
  0x55   : > { %s387_s10 = scalar_lea.vmem [#allocation6], %s1323_s30  ;;  %s384_s29 = scalar_lea.sflag [#allocation7], %s383_s22 }
  0x56   : > { %s394_s13 = sshll.u32 %s387_s10, 4  ;;  %s1827_s2 = smov [#allocation6]   ;;  %s395_s13 = int_to_ptr.vmem [resolvable:$true] %s394_s13 }
  0x57   : > { %s1712_s12 = scalar_lea.vmem %s395_s13, 128  ;;  %s1717_s24 = sshll.u32 %s1827_s2, 4  ;;  %s1718_s24 = int_to_ptr.vmem [resolvable:$false] %s1717_s24 }
  0x58   : > { %p1713_p3 = scmp.ne.s32.totalorder %s395_s13, %s1712_s12  ;;  %s1719_s0 = scalar_lea.vmem %s1718_s24, 256 }
  0x59   : > { %p1720_p9 = scmp.lt.s32.totalorder %s395_s13, %s1718_s24  ;;  %p1721_p13 = scmp.lt.s32.totalorder %s1719_s0, %s1712_s12 }
  0x5a   : > { %p1715_p10 = pnand %p1713_p3, %p1673_p1 }
  0x5b   : > { %p1722_p2 = por %p1721_p13, %p1720_p9 }
  0x5c   : > { %p1716_p11 = pneg %p1715_p10 }
  0x5e   : > { %p1723_p4 = pnand %p1722_p2, %p1716_p11 }
  0x60   : > { %1726 = shalt.err (!%p1723_p4)
}
  0x61   : > { %1491 = dma.hbm_to_vmem [thread:$0]  (!%p2011_p7), %s2018_s11, 128, %s395_s13, %s384_s29  }
  0x62   : > { %403 = sbr.rel (%p1946_p8) target bundleno = 1654 (0x676), region = 60  ;;  %s2037_s4 = sand.u32 (!%p1946_p8), 1, %s1803_s14  }
  0x63   : > { %s2040_s28 = sshll.u32 (!%p1946_p8), %s2037_s4, 3  ;;  %s406_s30 = scalar_lea.sflag (!%p1946_p8), [#allocation4], %s2037_s4 }
  0x64   : > { %s409_s27 = scalar_lea.vmem (!%p1946_p8), [#allocation3], %s2040_s28  ;;  %p2236_p1 = scmp.ne.s32.totalorder (!%p1946_p8), %s2223_s21, 0 }
  0x67   : > { %1778 = dma.done.wait (%p2236_p1), %s406_s30, 128  }
  0x68   : > { %1780 = vsyncadd (%p2236_p1), %s406_s30, 4294967168  ;;  %s414_s6 = sand.u32 1, %s1927_s19   ;;  %s418_s11 = scalar_lea.vmem [#allocation6], %s2040_s28 }
  0x69   : > { %s415_s23 = scalar_lea.sflag [#allocation7], %s414_s6 }
  0x6a   : > { %1782 = dma.done.wait (%p2236_p1), %s415_s23, 128  }
  0x6b   : > { %1784 = vsyncadd (%p2236_p1), %s415_s23, 4294967168  ;;  %p2237_p8 = scmp.eq.s32.totalorder %s1927_s19, 0 }
  0x6d   : > { %1786 = dma.done.wait (%p2237_p8), [#allocation7], 256   ;;  %p2238_p7 = pmov %p2237_p8 }
  0x6f   : > { %1788 = vsyncadd (%p2238_p7), [#allocation7], 4294967040  ;;  %p2239_p6 = pmov %p2238_p7 }
  0x71   : > { %1790 = dma.done.wait (%p2239_p6), [#allocation10], 512   ;;  %p2240_p12 = pmov %p2239_p6 }
  0x72   : > { %v1828_v0 = vmov 0.0   ;;  %vm1829_vm0 = vmmov 0   ;;  %v1569_v1 = vld [vmem:[#allocation9 + $0x8] sm:$0xff]   ;;  %v1570_v2 = vld [vmem:[#allocation8 + $0x8] sm:$0xff]   ;;  %v1571_v3 = vld [vmem:[#allocation9] sm:$0xff]   ;;  %vm499_vm1 = vcmask 261120  }
  0x73   : > { %1792 = vsyncadd (%p2240_p12), [#allocation10], 4294966784  ;;  %1393 = vmatprep.subr.bf16.mxu1 %v1828_v0  ;;  %1385 = vmatprep.subr.bf16.mxu0 %v1828_v0  ;;  %v1572_v4 = vld [vmem:[#allocation8] sm:$0xff]   ;;  %v474_v5 = vld [vmem:[%s418_s11] sm:$0xff]  ;;  %vm612_vm2 = vcmask 64512   ;;  %s1830_s10 = smov 112  }
  0x74   : > { %1397 = vmatprep.mubr.msk.bf16.mxu1 %vm1829_vm0, %v1828_v0  ;;  %1389 = vmatprep.mubr.msk.bf16.mxu0 %vm1829_vm0, %v1828_v0  ;;  %v2070_v6 = vld [vmem:[%s409_s27] sm:$0xff]  ;;  %v543_v7 = vpack.c.bf16 %v474_v5, %v474_v5  ;;  %v1338_v9 = vld [vmem:[%s2205_s5] ss:$0 sm:$0xff]  ;;  %s1831_s13 = smov 120   ;;  %s1832_s29 = smov 104   ;;  %vm675_vm3 = vcmask 1043456  }
  0x75   : > { %1394 = vmatpush3.bf16.msra.mxu1 %v1569_v1  ;;  %1386 = vmatpush3.bf16.msra.mxu0 %v1570_v2  ;;  %v475_v8 = vpack.c.bf16 %v2070_v6, %v2070_v6  ;;  %v1334_v10 = vld [vmem:[%s2203_s3] ss:$0 sm:$0xff]  ;;  %s1833_s12 = smov 96   ;;  %s1834_s2 = smov 80   ;;  %vm837_vm4 = vcmask 130112   ;;  %vm953_vm5 = vcmask 195712  }
  0x76   : > { %1395 = vmatprep.subr.bf16.mxu1 %v1828_v0  ;;  %1387 = vmatprep.subr.bf16.mxu0 %v1828_v0  ;;  %s1835_s24 = smov 72   ;;  %s1836_s0 = smov 88   ;;  %vm1069_vm6 = vcmask 261312  }
  0x77   : > { %s1837_s30 = smov 8   ;;  %s1838_s27 = smov 16  }
  0x78   : > { %s1839_s6 = smov 24  }
  0x79   : > { %1396 = vmatpush3.bf16.msra.mxu1 %v1571_v3  ;;  %1388 = vmatpush3.bf16.msra.mxu0 %v1572_v4 }
  0x7a   : > { %1407 = vmatprep.subr.bf16.mxu1 %v1828_v0  ;;  %1401 = vmatprep.subr.bf16.mxu0 %v1828_v0 }
  0x7c   : > { %1398 = vmatmul.mubr.msk.bf16.vlgmr.msra.gmra.mxu1 %vm499_vm1, %v543_v7  ;;  %1390 = vmatmul.mubr.msk.bf16.vlgmr.msra.gmra.mxu0 %vm499_vm1, %v475_v8 }
  0x7d   : > { %1409 = vmatprep.mubr.msk.bf16.mxu1 %vm1829_vm0, %v1828_v0  ;;  %1403 = vmatprep.mubr.msk.bf16.mxu0 %vm1829_vm0, %v1828_v0 }
 0x13c   : > { %v604_v11 = vpop.f32.mrf.mxu1  ;;  %v537_v13 = vpop.f32.mrf.mxu0 }
 0x13d   : > { %v605_v12 = vadd.f32 %v1338_v9, %v604_v11  ;;  %v538_v14 = vadd.f32 %v1334_v10, %v537_v13 }
 0x13e   : > { %v1399_v15 = vpop.f32.mrf.mxu1  ;;  %v1391_v17 = vpop.f32.mrf.mxu0 }
 0x13f   : > { %v2088_v16 = vpack.c.bf16 %v605_v12, %v605_v12  ;;  %v610_v19 = vpack.c.bf16 %v538_v14, %v538_v14 }
 0x140   : > { %v607_v18 = vpop.f32.mrf.mxu1  ;;  %v540_v20 = vpop.f32.mrf.mxu0 }
 0x141   : > { %841 = vrot.lane.b32.xlu1 %v2088_v16, %s1830_s10  ;;  %725 = vrot.lane.b32.xlu0 %v2088_v16, %s1831_s13  ;;  %v617_v21 = vsel %vm612_vm2, %v2088_v16, 0 }
 0x142   : > { %v1400_v22 = vpop.f32.mrf.mxu1  ;;  %1402 = vmatpush3.bf16.xpose.msra.mxu0 %v617_v21  ;;  %v1392_v23 = vpop.f32.mrf.mxu0 }
 0x143   : > { %1413 = vmatprep.subr.bf16.mxu0 %v1828_v0 }
 0x145   : > { %839 = vrot.lane.b32.xlu1 %v610_v19, %s1830_s10  ;;  %723 = vrot.lane.b32.xlu0 %v610_v19, %s1831_s13  ;;  %s1357_s10 = sshll.u32 %s1811_s16, 7  ;;  %s471_s13 = scalar_lea.vmem [#allocation12], %s2040_s28 }
 0x149   : > { %955 = vrot.lane.b32.xlu1 %v610_v19, %s1832_s29  ;;  %957 = vrot.lane.b32.xlu0 %v2088_v16, %s1832_s29  ;;  %s1185_s29 = sshll.u32 %s471_s13, 4  ;;  %s1186_s29 = int_to_ptr.vmem [resolvable:$true] %s1185_s29 }
 0x14a   : > { %1404 = vmatmul.mubr.msk.bf16.vlgmr.msra.gmra.mxu0 %vm612_vm2, %v610_v19 }
 0x14b   : > { %1415 = vmatprep.mubr.msk.bf16.mxu0 %vm1829_vm0, %v1828_v0 }
 0x14d   : > { %670 = vrot.lane.b32.xlu1 %v2088_v16, %s1833_s12 }
 0x1b3   : > { %v842_v24 = vpop.permute.xlu1 %841  ;;  %v726_v25 = vpop.permute.xlu0 %725 }
 0x1b4   : > { %v731_v26 = vsel %vm612_vm2, %v726_v25, 0  ;;  %v847_v30 = vsel %vm612_vm2, %v842_v24, 0 }
 0x1b5   : > { %1414 = vmatpush3.bf16.xpose.msra.mxu0 %v731_v26 }
 0x1b6   : > { %1425 = vmatprep.subr.bf16.mxu0 %v1828_v0 }
 0x1b7   : > { %v840_v27 = vpop.permute.xlu1 %839  ;;  %v724_v28 = vpop.permute.xlu0 %723 }
 0x1bb   : > { %v956_v29 = vpop.permute.xlu1 %955  ;;  %v958_v33 = vpop.permute.xlu0 %957 }
 0x1bc   : > { %1416 = vmatmul.mubr.msk.bf16.vlgmr.msra.gmra.mxu0 %vm612_vm2, %v724_v28  ;;  %v963_v34 = vsel %vm612_vm2, %v958_v33, 0 }
 0x1bd   : > { %1426 = vmatpush3.bf16.xpose.msra.mxu0 %v847_v30  ;;  %1427 = vmatprep.mubr.msk.bf16.mxu0 %vm1829_vm0, %v1828_v0 }
 0x1be   : > { %1437 = vmatprep.subr.bf16.mxu0 %v1828_v0 }
 0x1bf   : > { %v671_v31 = vpop.permute.xlu1 %670 }
 0x1c0   : > { %v677_v32 = vsel %vm675_vm3, %v671_v31, 0 }
 0x1c1   : > { %1408 = vmatpush3.bf16.msra.mxu1 %v677_v32 }
 0x1c2   : > { %1419 = vmatprep.subr.bf16.mxu1 %v1828_v0 }
 0x1c4   : > { %1428 = vmatmul.mubr.msk.bf16.vlgmr.msra.gmra.mxu0 %vm612_vm2, %v840_v27 }
 0x1c5   : > { %1438 = vmatpush3.bf16.xpose.msra.mxu0 %v963_v34  ;;  %1439 = vmatprep.mubr.msk.bf16.mxu0 %vm1829_vm0, %v1828_v0 }
 0x1c6   : > { %1449 = vmatprep.subr.bf16.mxu0 %v1828_v0 }
 0x1cc   : > { %1440 = vmatmul.mubr.msk.bf16.vlgmr.msra.gmra.mxu0 %vm612_vm2, %v956_v29 }
 0x1cd   : > { %1453 = vmatprep.mubr.msk.bf16.mxu0 %vm1829_vm0, %v1828_v0 }
 0x20a   : > { %v653_v35 = vpop.f32.mrf.mxu0 }
 0x20b   : > { %v659_v36 = vsel %vm612_vm2, %v653_v35, -inf }
 0x20c   : > { %660 = vmax.xlane.f32.xlu0 %v659_v36  ;;  %v1405_v37 = vpop.f32.mrf.mxu0 }
 0x20e   : > { %v656_v38 = vpop.f32.mrf.mxu0 }
 0x210   : > { %v1406_v39 = vpop.f32.mrf.mxu0 }
 0x211   : > { %v1573_v39 = vld [vmem:[#allocation11 + $0x8] sm:$0xff]  }
 0x212   : > { %1450 = vmatpush3.bf16.msra.mxu0 %v1573_v39 }
 0x213   : > { %1451 = vmatprep.subr.bf16.mxu0 %v1828_v0 }
 0x27c   : > { %v767_v40 = vpop.f32.mrf.mxu0 }
 0x27d   : > { %v773_v41 = vsel %vm612_vm2, %v767_v40, -inf }
 0x27e   : > { %774 = vmax.xlane.f32.xlu1 %v773_v41  ;;  %v1417_v42 = vpop.f32.mrf.mxu0 }
 0x27f   : > { %v1574_v42 = vld [vmem:[#allocation11] sm:$0xff]  }
 0x280   : > { %v770_v43 = vpop.f32.mrf.mxu0  ;;  %1452 = vmatpush3.bf16.msra.mxu0 %v1574_v42 }
 0x282   : > { %v1418_v44 = vpop.f32.mrf.mxu0 }
 0x284   : > { %v883_v45 = vpop.f32.mrf.mxu0 }
 0x285   : > { %v889_v46 = vsel %vm612_vm2, %v883_v45, -inf }
 0x286   : > { %890 = vmax.xlane.f32.xlu0 %v889_v46  ;;  %v1429_v47 = vpop.f32.mrf.mxu0 }
 0x288   : > { %v886_v48 = vpop.f32.mrf.mxu0 }
 0x28a   : > { %v1430_v49 = vpop.f32.mrf.mxu0 }
 0x28c   : > { %v999_v50 = vpop.f32.mrf.mxu0 }
 0x28d   : > { %v1005_v51 = vsel %vm612_vm2, %v999_v50, -inf }
 0x28e   : > { %1006 = vmax.xlane.f32.xlu0 %v1005_v51  ;;  %v1441_v52 = vpop.f32.mrf.mxu0 }
 0x28f   : > { %899 = vrot.lane.b32.xlu1 %v2088_v16, %s1834_s2 }
 0x290   : > { %v1002_v53 = vpop.f32.mrf.mxu0 }
 0x292   : > { %v1442_v54 = vpop.f32.mrf.mxu0 }
 0x293   : > { %1015 = vrot.lane.b32.xlu1 %v2088_v16, %s1835_s24  ;;  %s2241_s24 = sld [smem:[#allocation25_spill]] }
 0x295   : > { %v661_v55 = vpop.xlane.xlu0 %660 }
 0x296   : > { %v662_v56 = vsub.f32 %v653_v35, %v661_v55 }
 0x298   : > { %v663_v57 = vmul.f32 1.442695, %v662_v56 }
 0x29a   : > { %1575 = vpow2.f32 %v663_v57  ;;  %v1350_v57 = vld [vmem:[%s2207_s7] ss:$0 sm:$0xff] }
 0x2a4   : > { %783 = vrot.lane.b32.xlu0 %v2088_v16, %s1836_s0  ;;  %s1183_s0 = scalar_lea.hbm %s2241_s24, %s1357_s10 }
 0x2a7   : > { %v1576_v58 = vpop.eup %1575 }
 0x2a8   : > { %v668_v59 = vpack.c.bf16 %v1576_v58, %v1576_v58  ;;  %v665_v21 = vsel %vm612_vm2, %v1576_v58, 0.0 }
 0x2aa   : > { %1410 = vmatmul.mubr.msk.bf16.vlgmr.msra.gmra.mxu1 %vm612_vm2, %v668_v59 }
 0x2ab   : > { %1421 = vmatprep.mubr.msk.bf16.mxu1 %vm1829_vm0, %v1828_v0 }
 0x307   : > { %v775_v60 = vpop.xlane.xlu1 %774 }
 0x308   : > { %v776_v61 = vsub.f32 %v767_v40, %v775_v60 }
 0x30a   : > { %v777_v62 = vmul.f32 1.442695, %v776_v61 }
 0x30b   : > { %v900_v11 = vpop.permute.xlu1 %899 }
 0x30c   : > { %1577 = vpow2.f32 %v777_v62  ;;  %v905_v13 = vsel %vm675_vm3, %v900_v11, 0  ;;  %v1354_v11 = vld [vmem:[%s2208_s8] ss:$0 sm:$0xff] }
 0x30f   : > { %v891_v63 = vpop.xlane.xlu0 %890  ;;  %v1016_v16 = vpop.permute.xlu1 %1015 }
 0x310   : > { %v892_v1 = vsub.f32 %v883_v45, %v891_v63  ;;  %v1021_v18 = vsel %vm675_vm3, %v1016_v16, 0 }
 0x312   : > { %v893_v2 = vmul.f32 1.442695, %v892_v1 }
 0x314   : > { %1579 = vpow2.f32 %v893_v2 }
 0x317   : > { %v1007_v3 = vpop.xlane.xlu0 %1006 }
 0x318   : > { %v1008_v4 = vsub.f32 %v999_v50, %v1007_v3 }
 0x319   : > { %v1578_v5 = vpop.eup %1577 }
 0x31a   : > { %v1009_v7 = vmul.f32 1.442695, %v1008_v4  ;;  %v779_v8 = vsel %vm612_vm2, %v1578_v5, 0.0  ;;  %v782_v12 = vpack.c.bf16 %v1578_v5, %v1578_v5 }
 0x31b   : > { %780 = vadd.xlane.f32.xlu0 %v779_v8  ;;  %v784_v9 = vpop.permute.xlu0 %783 }
 0x31c   : > { %1581 = vpow2.f32 %v1009_v7  ;;  %v789_v10 = vsel %vm675_vm3, %v784_v9, 0 }
 0x31d   : > { %1420 = vmatpush3.bf16.msra.mxu1 %v789_v10 }
 0x31e   : > { %1431 = vmatprep.subr.bf16.mxu1 %v1828_v0 }
 0x320   : > { %1422 = vmatmul.mubr.msk.bf16.vlgmr.msra.gmra.mxu1 %vm612_vm2, %v782_v12 }
 0x321   : > { %v1580_v14 = vpop.eup %1579  ;;  %1432 = vmatpush3.bf16.msra.mxu1 %v905_v13  ;;  %1433 = vmatprep.mubr.msk.bf16.mxu1 %vm1829_vm0, %v1828_v0  ;;  %v1355_v13 = vld [vmem:[%s2209_s9] ss:$0 sm:$0xff] }
 0x322   : > { %v895_v15 = vsel %vm612_vm2, %v1580_v14, 0.0  ;;  %1443 = vmatprep.subr.bf16.mxu1 %v1828_v0  ;;  %v898_v17 = vpack.c.bf16 %v1580_v14, %v1580_v14 }
 0x323   : > { %896 = vadd.xlane.f32.xlu1 %v895_v15 }
 0x328   : > { %1434 = vmatmul.mubr.msk.bf16.vlgmr.msra.gmra.mxu1 %vm612_vm2, %v898_v17 }
 0x329   : > { %v1582_v19 = vpop.eup %1581  ;;  %1444 = vmatpush3.bf16.msra.mxu1 %v1021_v18  ;;  %1445 = vmatprep.mubr.msk.bf16.mxu1 %vm1829_vm0, %v1828_v0 }
 0x32a   : > { %v1011_v20 = vsel %vm612_vm2, %v1582_v19, 0.0  ;;  %v1014_v22 = vpack.c.bf16 %v1582_v19, %v1582_v19 }
 0x32b   : > { %1012 = vadd.xlane.f32.xlu0 %v1011_v20 }
 0x32f   : > { %666 = vadd.xlane.f32.xlu0 %v665_v21 }
 0x330   : > { %1446 = vmatmul.mubr.msk.bf16.vlgmr.msra.gmra.mxu1 %vm612_vm2, %v1014_v22 }
 0x36a   : > { %v713_v23 = vpop.f32.mrf.mxu1 }
 0x36c   : > { %v1411_v24 = vpop.f32.mrf.mxu1 }
 0x36e   : > { %v716_v25 = vpop.f32.mrf.mxu1 }
 0x370   : > { %v1412_v26 = vpop.f32.mrf.mxu1 }
 0x3a4   : > { %v781_v27 = vpop.xlane.xlu0 %780 }
 0x3ac   : > { %v897_v32 = vpop.xlane.xlu1 %896 }
 0x3b4   : > { %v1013_v28 = vpop.xlane.xlu0 %1012 }
 0x3b8   : > { %v667_v29 = vpop.xlane.xlu0 %666 }
 0x3b9   : > { %1583 = vrcp.f32 %v667_v29 }
 0x3ba   : > { %1585 = vrcp.f32 %v781_v27 }
 0x3bb   : > { %1587 = vrcp.f32 %v897_v32 }
 0x3bc   : > { %1589 = vrcp.f32 %v1013_v28 }
 0x3c6   : > { %v1584_v30 = vpop.eup %1583 }
 0x3c7   : > { %v720_v31 = vmul.f32 %v1584_v30, %v713_v23  ;;  %v1586_v33 = vpop.eup %1585 }
 0x3c8   : > { %v1588_v40 = vpop.eup %1587 }
 0x3c9   : > { %721 = vst.msk [vmem:[#allocation2] sm:$0xff] %vm612_vm2, %v720_v31  ;;  %v1590_v47 = vpop.eup %1589 }
 0x3e0   : > { %v825_v34 = vpop.f32.mrf.mxu1 }
 0x3e1   : > { %v832_v35 = vmul.f32 %v1586_v33, %v825_v34 }
 0x3e2   : > { %v1423_v36 = vpop.f32.mrf.mxu1 }
 0x3e3   : > { %834 = vrot.lane.b32.xlu1 %v832_v35, %s1837_s30  ;;  %s1171_s30 = scalar_lea.sflag [#allocation5], %s2037_s4 }
 0x3e4   : > { %v828_v37 = vpop.f32.mrf.mxu1 }
 0x3e6   : > { %v1424_v38 = vpop.f32.mrf.mxu1 }
 0x3e8   : > { %v941_v41 = vpop.f32.mrf.mxu1 }
 0x3e9   : > { %v948_v43 = vmul.f32 %v1588_v40, %v941_v41 }
 0x3ea   : > { %v1435_v44 = vpop.f32.mrf.mxu1 }
 0x3eb   : > { %950 = vrot.lane.b32.xlu0 %v948_v43, %s1838_s27  ;;  %s1727_s27 = scalar_lea.vmem %s1186_s29, 128 }
 0x3ec   : > { %v944_v45 = vpop.f32.mrf.mxu1  ;;  %p1728_p0 = scmp.ne.s32.totalorder %s1186_s29, %s1727_s27 }
 0x3ee   : > { %v1436_v46 = vpop.f32.mrf.mxu1  ;;  %p1729_p3 = pnand %p1728_p0, %p1992_p5 }
 0x3f0   : > { %v1057_v48 = vpop.f32.mrf.mxu1  ;;  %p1730_p10 = pneg %p1729_p3 }
 0x3f1   : > { %v1064_v49 = vmul.f32 %v1590_v47, %v1057_v48 }
 0x3f2   : > { %v1447_v50 = vpop.f32.mrf.mxu1 }
 0x3f3   : > { %1066 = vrot.lane.b32.xlu1 %v1064_v49, %s1839_s6  ;;  %s1840_s6 = smov [#allocation12]  }
 0x3f4   : > { %v1060_v51 = vpop.f32.mrf.mxu1  ;;  %s1731_s23 = sshll.u32 %s1840_s6, 4  ;;  %s1732_s23 = int_to_ptr.vmem [resolvable:$false] %s1731_s23 }
 0x3f5   : > { %s1733_s16 = scalar_lea.vmem %s1732_s23, 256  ;;  %p1734_p11 = scmp.lt.s32.totalorder %s1186_s29, %s1732_s23 }
 0x3f6   : > { %v1448_v52 = vpop.f32.mrf.mxu1  ;;  %p1735_p9 = scmp.lt.s32.totalorder %s1733_s16, %s1727_s27 }
 0x3f8   : > { %p1736_p13 = por %p1735_p9, %p1734_p11 }
 0x3fa   : > { %p1737_p2 = pnand %p1736_p13, %p1730_p10 }
 0x455   : > { %v835_v53 = vpop.permute.xlu1 %834 }
 0x456   : > { %838 = vst.msk [vmem:[#allocation2] sm:$0xff] %vm837_vm4, %v835_v53 }
 0x45d   : > { %v951_v54 = vpop.permute.xlu0 %950 }
 0x45e   : > { %954 = vst.msk [vmem:[#allocation2] sm:$0xff] %vm953_vm5, %v951_v54 }
 0x465   : > { %v1067_v0 = vpop.permute.xlu1 %1066 }
 0x466   : > { %1070 = vst.msk [vmem:[#allocation2] sm:$0xff] %vm1069_vm6, %v1067_v0 }
 0x46d   : > { %v1071_v55 = vld [vmem:[#allocation2] sm:$0xff] }
 0x46e   : > { %v1072_v56 = vpack.c.bf16 %v1071_v55, %v1071_v55 }
 0x470   : > { %1454 = vmatmul.mubr.msk.bf16.vlgmr.msra.gmra.mxu0 %vm499_vm1, %v1072_v56 }
 0x530   : > { %v1133_v58 = vpop.f32.mrf.mxu0 }
 0x531   : > { %v1134_v59 = vadd.f32 %v1350_v57, %v1133_v58 }
 0x532   : > { %v1455_v60 = vpop.f32.mrf.mxu0 }
 0x533   : > { %v1141_v61 = vadd.f32 %v1134_v59, %v2070_v6 }
 0x534   : > { %v1136_v62 = vpop.f32.mrf.mxu0 }
 0x535   : > { %v1142_v63 = vsel %vm499_vm1, %v1141_v61, 0.0 }
 0x536   : > { %1143 = vadd.xlane.f32.xlu1 %v1142_v63  ;;  %v1456_v1 = vpop.f32.mrf.mxu0 }
 0x5bf   : > { %v1144_v2 = vpop.xlane.xlu1 %1143 }
 0x5c0   : > { %v1145_v3 = vmul.f32 0.03125, %v1144_v2 }
 0x5c2   : > { %v1146_v4 = vsub.f32 %v1141_v61, %v1145_v3 }
 0x5c4   : > { %v1147_v5 = vmul.f32 %v1146_v4, %v1146_v4 }
 0x5c6   : > { %v1148_v7 = vsel %vm499_vm1, %v1147_v5, 0.0 }
 0x5c7   : > { %1149 = vadd.xlane.f32.xlu0 %v1148_v7 }
 0x650   : > { %v1150_v8 = vpop.xlane.xlu0 %1149 }
 0x651   : > { %v1151_v9 = vmul.f32 0.03125, %v1150_v8 }
 0x653   : > { %v1152_v10 = vadd.f32 1e-12, %v1151_v9 }
 0x655   : > { %1591 = vrsqrt.f32 %v1152_v10 }
 0x662   : > { %v1592_v6 = vpop.eup %1591 }
 0x663   : > { %v1154_v12 = vmul.f32 %v1592_v6, %v1146_v4 }
 0x665   : > { %v1161_v14 = vmul.f32 %v1354_v11, %v1154_v12 }
 0x667   : > { %v1168_v15 = vadd.f32 %v1355_v13, %v1161_v14 }
 0x669   : > { %1169 = vst.msk [vmem:[%s471_s13] sm:$0xff] %vm499_vm1, %v1168_v15 }
 0x66a   : > { %1740 = shalt.err (!%p1737_p2)
}
 0x66b   : > { %s1741_s28 = scalar_lea.hbm %s1183_s0, 128  ;;  %s1745_s19 = scalar_lea.hbm %s2241_s24, 256 }
 0x66c   : > { %p1742_p4 = scmp.ne.s32.totalorder %s1183_s0, %s1741_s28  ;;  %p1746_p7 = scmp.lt.s32.totalorder %s1183_s0, %s2241_s24 }
 0x66d   : > { %p1747_p6 = scmp.lt.s32.totalorder %s1745_s19, %s1741_s28 }
 0x66e   : > { %p1743_p1 = pnand %p1742_p4, %p1992_p5 }
 0x66f   : > { %p1748_p12 = por %p1747_p6, %p1746_p7 }
 0x670   : > { %p1744_p8 = pneg %p1743_p1 }
 0x672   : > { %p1749_p0 = pnand %p1748_p12, %p1744_p8 }
 0x674   : > { %1752 = shalt.err (!%p1749_p0)
}
 0x675   : > { %1473 = dma.vmem_to_hbm [thread:$0]  (%p1992_p5), %s1186_s29, 128, %s1183_s0, %s1171_s30  }
 0x676 PF: > { %s2242_s25 = sld [smem:[#allocation18_spill]]  ;;  %p2245_p10 = scmp.ge.s32.totalorder %s1819_s18, 2 }
 0x677   : > { %s2243_s10 = sld [smem:[#allocation19_spill]] }
 0x67c   : > { %s1197_s13 = sand.u32 1, %s2242_s25  }
 0x67d   : > { %p2244_p3 = scmp.ne.s32.totalorder %s2243_s10, 0  ;;  %s1198_s12 = scalar_lea.sflag [#allocation5], %s1197_s13 }
 0x67f   : > { %p1493_p11 = pnand %p2245_p10, %p2244_p3 }
 0x681   : > { %p1494_p9 = pneg %p1493_p11 }
 0x683   : > { %1794 = dma.done.wait (%p1494_p9), %s1198_s12, 128  }
 0x684   : > { %1796 = vsyncadd (%p1494_p9), %s1198_s12, 4294967168  ;;  %s30_s18 = sadd.s32 1, %s1819_s18   ;;  %s2246_s26 = sld [smem:[#allocation20_spill]] }
 0x685   : > { %p27_p13 = scmp.ge.s32.totalorder %s30_s18, 4   ;;  %s2247_s13 = smov %s1803_s14 }
 0x686   : > { %s2248_s14 = smov %s1807_s15  ;;  %s2249_s15 = smov %s2004_s20 }
 0x687   : > { %s2250_s16 = smov %s1815_s17  ;;  %29 = sbr.rel (!%p27_p13) target bundleno = 15 (0xf), region = 130 }
 0x68a   : > { %s2251_s17 = smov %s2246_s26 }
 0x68c   :  { %1203 = vsyncpa [#allocation4], 1 }
 0x68d   :  { %1205 = vsyncpa [#allocation4 + $0x1], 1 }
 0x68e   :  { %1206 = vsyncpa [#allocation7], 1 }
 0x68f   :  { %1208 = vsyncpa [#allocation7 + $0x1], 1 }
 0x690   :  { %1209 = vsyncpa [#allocation10], 1 }
 0x691   :  { %1210 = vsyncpa [#allocation5], 1 }
 0x692   :  { %1212 = vsyncpa [#allocation5 + $0x1], 1 }

</bundles_post_ra>
